<compile_context>
chip_gen: v7x
topology: tpu7x:2x2x1
jax: 0.10.0
libtpu: 0.0.40
codegen_flags: <defaults>
</compile_context>

<pallas_src>
import jax
import jax.numpy as jnp
from jax import lax
from jax.experimental import pallas as pl
from jax.experimental.pallas import tpu as pltpu

IN_FEATURES = 784   # 1 * 28 * 28
OUT_FEATURES = 10

DEFAULT_BLOCK_BATCH = 2048  # rows per tile (multiple of 128 when tiling kicks in)
LANE = 128
SUBLANE = 8


def _round_up(n, m):
    return ((n + m - 1) // m) * m


def netlin_kernel(x_ref, w_ref, b_ref, o_ref):
    # x_ref: (TB, 784) native dtype; w_ref: (10, 784) compute dtype;
    # b_ref: (10, 1) f32; o_ref: (10, TB) f32 (lane-dense).
    x = x_ref[...]
    w = w_ref[...]
    if x.dtype != w.dtype:
        # Integer activations (e.g. raw uint8 pixels): cast to the MXU dtype
        # (bf16). f32 / bf16 feeds skip this and go straight to the MXU.
        x = x.astype(w.dtype)

    # z_T[c, n] = sum_k W[c, k] * x[n, k]  -> (10, TB), f32 accumulation on MXU.
    z = lax.dot_general(
        w, x,
        dimension_numbers=(((1,), (1,)), ((), ())),
        preferred_element_type=jnp.float32,
    ) + b_ref[...]                                            # (10, TB) + (10, 1)

    # Numerically-stable log_softmax over the class axis (axis=0 here).
    m = jnp.max(z, axis=0, keepdims=True)                     # (1, TB)
    s = z - m
    lse = jnp.log(jnp.sum(jnp.exp(s), axis=0, keepdims=True))
    o_ref[...] = s - lse                                      # unmasked, lane-dense store


def netlin_forward(x_nchw, w, b, *, block_batch=DEFAULT_BLOCK_BATCH):
    """x_nchw: (B, 1, 28, 28), float32 / bfloat16 / integer dtype.
    w: (10, 784) float32 (natural nn.Linear layout). b: (10,) float32.
    Returns (B, 10) float32 log-probabilities (matches PyTorch NetLin.forward)."""
    batch = x_nchw.shape[0]
    x_flat = x_nchw.reshape(batch, IN_FEATURES)   # layout glue only; keep native dtype

    # MXU compute dtype: f32 stays f32; everything else runs as bf16.
    # Weights are tiny (10x784) so the wrapper-side cast is free.
    compute_dtype = jnp.float32 if x_flat.dtype == jnp.float32 else jnp.bfloat16
    w_k = jnp.asarray(w, compute_dtype)
    b_k = jnp.asarray(b, jnp.float32).reshape(OUT_FEATURES, 1)

    if batch <= block_batch:
        tb = batch                          # single tile: blocks equal the full array dims
    else:
        tb = _round_up(block_batch, LANE)   # lane-dense (10, tb) out block needs tb % 128 == 0
    grid = (pl.cdiv(batch, tb),)

    # Explicit scoped-VMEM budget. Counts the 784->896 lane padding and the
    # double buffers, plus headroom for the in-kernel int->bf16 cast temp.
    x_itemsize = jnp.dtype(x_flat.dtype).itemsize
    k_pad = _round_up(IN_FEATURES, LANE)
    tb_pad = _round_up(tb, LANE)
    x_bytes = 2 * tb_pad * k_pad * x_itemsize                     # double-buffered x stream
    o_bytes = 2 * _round_up(OUT_FEATURES, SUBLANE) * tb_pad * 4   # double-buffered output
    w_bytes = _round_up(OUT_FEATURES, SUBLANE) * k_pad * jnp.dtype(compute_dtype).itemsize
    cast_bytes = tb_pad * k_pad * 2 if jnp.dtype(compute_dtype) != jnp.dtype(x_flat.dtype) else 0
    vmem_limit = int(min(max(x_bytes + o_bytes + w_bytes + cast_bytes + (4 << 20), 32 << 20),
                         56 << 20))  # stays under v7x's 64 MiB physical VMEM

    cost = pl.CostEstimate(
        flops=2 * batch * IN_FEATURES * OUT_FEATURES,
        transcendentals=2 * batch * OUT_FEATURES,        # exp + log per class entry
        bytes_accessed=(batch * IN_FEATURES * x_itemsize
                        + OUT_FEATURES * IN_FEATURES * jnp.dtype(compute_dtype).itemsize
                        + OUT_FEATURES * 4
                        + batch * OUT_FEATURES * 4),
    )

    out_t = pl.pallas_call(
        netlin_kernel,
        out_shape=jax.ShapeDtypeStruct((OUT_FEATURES, batch), jnp.float32),
        grid_spec=pltpu.PrefetchScalarGridSpec(
            num_scalar_prefetch=0,
            grid=grid,
            in_specs=[
                # x: streamed tile-by-tile over the batch (double-buffered).
                pl.BlockSpec((tb, IN_FEATURES), lambda i: (i, 0)),
                # W, b: resident across all grid steps (constant block index).
                pl.BlockSpec((OUT_FEATURES, IN_FEATURES), lambda i: (0, 0)),
                pl.BlockSpec((OUT_FEATURES, 1), lambda i: (0, 0)),
            ],
            out_specs=pl.BlockSpec((OUT_FEATURES, tb), lambda i: (0, i)),
        ),
        compiler_params=pltpu.CompilerParams(
            dimension_semantics=("parallel",),
            vmem_limit_bytes=vmem_limit,
        ),
        cost_estimate=cost,
    )(x_flat, w_k, b_k)

    # Back to the PyTorch (B, 10) layout — trivial wrapper-side transpose.
    return out_t.T


def init_params(key):
    """Deterministic init matching nn.Linear(784, 10) defaults:
    uniform(-1/sqrt(784), 1/sqrt(784)) for both weight and bias."""
    kw, kb = jax.random.split(key)
    bound = 1.0 / jnp.sqrt(jnp.float32(IN_FEATURES))
    w = jax.random.uniform(kw, (OUT_FEATURES, IN_FEATURES), jnp.float32,
                           minval=-bound, maxval=bound)
    b = jax.random.uniform(kb, (OUT_FEATURES,), jnp.float32,
                           minval=-bound, maxval=bound)
    return w, b


if __name__ == "__main__":
    key = jax.random.PRNGKey(0)
    k1, k2, k3, kp = jax.random.split(key, 4)
    w, b = init_params(kp)

    def ref_fn(x2d, w2d, b1d):
        return jax.nn.log_softmax(
            x2d.astype(jnp.float32) @ w2d.astype(jnp.float32).T + b1d[None, :], axis=1)

    # --- 1) float32, small single-tile batch --------------------------------
    batch = 8
    x = jax.random.normal(k1, (batch, 1, 28, 28), jnp.float32)
    out = jax.block_until_ready(netlin_forward(x, w, b))
    ref = ref_fn(x.reshape(batch, -1), w, b)
    assert out.shape == (batch, OUT_FEATURES)
    assert jnp.allclose(out, ref, atol=1e-5, rtol=1e-5)

    # --- 2) bf16 stream, multi-tile + partial last tile (B % TB != 0) -------
    batch2 = 300
    x2 = jax.random.normal(k2, (batch2, 1, 28, 28), jnp.float32).astype(jnp.bfloat16)
    out2 = jax.block_until_ready(netlin_forward(x2, w, b, block_batch=128))
    ref2 = ref_fn(x2.reshape(batch2, -1), w.astype(jnp.bfloat16), b)
    assert out2.shape == (batch2, OUT_FEATURES)
    assert jnp.allclose(out2, ref2, atol=1e-2, rtol=1e-2)

    # --- 3) uint8 pixels (raw-MNIST-style); in-kernel cast to bf16 ----------
    batch3 = 32
    x3 = jax.random.randint(k3, (batch3, 1, 28, 28), 0, 256, jnp.int32).astype(jnp.uint8)
    out3 = jax.block_until_ready(netlin_forward(x3, w, b))
    ref3 = ref_fn(x3.reshape(batch3, -1), w.astype(jnp.bfloat16), b)
    assert out3.shape == (batch3, OUT_FEATURES)
    assert jnp.allclose(out3, ref3, atol=5e-2, rtol=5e-2)

    print("KERNEL_OK")
</pallas_src>

<mosaic_0001>
module attributes {stable_mosaic.version = 11 : i64} {
  func.func @netlin_kernel(%arg0: i32, %arg1: memref<8x784xf32, #tpu.memory_space<vmem>>, %arg2: memref<10x784xf32, #tpu.memory_space<vmem>>, %arg3: memref<10x1xf32, #tpu.memory_space<vmem>>, %arg4: memref<10x8xf32, #tpu.memory_space<vmem>>) attributes {dimension_semantics = [#tpu.dimension_semantics<parallel>], iteration_bounds = array<i64: 1>, scalar_prefetch = 0 : i64, scratch_operands = 0 : i64, tpu.core_type = #tpu.core_type<tc>, window_params = [{transform_indices = @transform_0, window_bounds = array<i64: 8, 784>}, {pipeline_mode = #tpu.pipeline_mode<synchronous>, transform_indices = @transform_1, window_bounds = array<i64: 10, 784>}, {pipeline_mode = #tpu.pipeline_mode<synchronous>, transform_indices = @transform_2, window_bounds = array<i64: 10, 1>}, {transform_indices = @transform_3, window_bounds = array<i64: 10, 8>}]} {
    %c0 = arith.constant 0 : index
    %c0_0 = arith.constant 0 : index
    %0 = vector.load %arg1[%c0, %c0_0] : memref<8x784xf32, #tpu.memory_space<vmem>>, vector<8x784xf32>
    %c0_1 = arith.constant 0 : index
    %c0_2 = arith.constant 0 : index
    %1 = vector.load %arg2[%c0_1, %c0_2] : memref<10x784xf32, #tpu.memory_space<vmem>>, vector<10x784xf32>
    %cst = arith.constant dense<0.000000e+00> : vector<10x8xf32>
    %2 = tpu.matmul %1, %0, %cst {dimension_numbers = #tpu.dot_dimension_numbers<[1], [1], [0], [0], [0, 0, 1, 0], [], []>} : vector<10x784xf32>, vector<8x784xf32>, vector<10x8xf32> -> vector<10x8xf32>
    %c0_3 = arith.constant 0 : index
    %c0_4 = arith.constant 0 : index
    %3 = vector.load %arg3[%c0_3, %c0_4] : memref<10x1xf32, #tpu.memory_space<vmem>>, vector<10x1xf32>
    %4 = vector.broadcast %3 : vector<10x1xf32> to vector<10x8xf32>
    %5 = arith.addf %2, %4 : vector<10x8xf32>
    %cst_5 = arith.constant dense<0xFF800000> : vector<8xf32>
    %6 = vector.multi_reduction <maximumf>, %5, %cst_5 [0] : vector<10x8xf32> to vector<8xf32>
    %7 = vector.shape_cast %6 : vector<8xf32> to vector<1x8xf32>
    %8 = vector.broadcast %7 : vector<1x8xf32> to vector<10x8xf32>
    %9 = arith.subf %5, %8 : vector<10x8xf32>
    %10 = math.exp %9 : vector<10x8xf32>
    %cst_6 = arith.constant dense<0.000000e+00> : vector<8xf32>
    %11 = vector.multi_reduction <add>, %10, %cst_6 [0] : vector<10x8xf32> to vector<8xf32>
    %12 = vector.shape_cast %11 : vector<8xf32> to vector<1x8xf32>
    %13 = math.log %12 : vector<1x8xf32>
    %14 = vector.broadcast %13 : vector<1x8xf32> to vector<10x8xf32>
    %15 = arith.subf %9, %14 : vector<10x8xf32>
    %c0_7 = arith.constant 0 : index
    %c0_8 = arith.constant 0 : index
    %16 = vector.load %arg4[%c0_7, %c0_8] : memref<10x8xf32, #tpu.memory_space<vmem>>, vector<10x8xf32>
    tpu.vector_store %arg4[%c0_7, %c0_8], %15 {strides = array<i32>} : memref<10x8xf32, #tpu.memory_space<vmem>>, vector<10x8xf32>,
    return
  }
  func.func @transform_0(%arg0: i32) -> (i32, i32) {
    %c0_i32 = arith.constant 0 : i32
    %c0_i32_0 = arith.constant 0 : i32
    return %arg0, %c0_i32 : i32, i32
  }
  func.func @transform_1(%arg0: i32) -> (i32, i32) {
    %c0_i32 = arith.constant 0 : i32
    %c0_i32_0 = arith.constant 0 : i32
    %c0_i32_1 = arith.constant 0 : i32
    return %c0_i32, %c0_i32_0 : i32, i32
  }
  func.func @transform_2(%arg0: i32) -> (i32, i32) {
    %c0_i32 = arith.constant 0 : i32
    %c0_i32_0 = arith.constant 0 : i32
    %c0_i32_1 = arith.constant 0 : i32
    return %c0_i32, %c0_i32_0 : i32, i32
  }
  func.func @transform_3(%arg0: i32) -> (i32, i32) {
    %c0_i32 = arith.constant 0 : i32
    %c0_i32_0 = arith.constant 0 : i32
    return %c0_i32, %arg0 : i32, i32
  }
}

</mosaic_0001>

<bundles_post_ra>
// kernel: tpu_custom_call.1
= control target key start
LH: loop header
LB: loop body
LE: loop exit
PB: predicated region body
PF: predicated region fallthrough
CT: control target
= control target key end

     0   :  { %8 = vsyncpa [#allocation3], 0  ;;  %s578_s0 = inlined_call_operand.hbm [shape: f32[8,784], index: 0, kind: input, shape index: {}]   ;;  %s579_s1 = inlined_call_operand.hbm [shape: f32[10,784], index: 1, kind: input, shape index: {}]   ;;  %s580_s2 = inlined_call_operand.vmem [shape: f32[10,1], index: 2, kind: input, shape index: {}]   ;;  %s581_s3 = inlined_call_operand.vmem [shape: f32[10,8], index: 3, kind: output, shape index: {}]  }
   0x1   :  { %9 = vsyncpa [#allocation5], 0  ;;  %s500_s12 = smov [#allocation2]   ;;  %s501_s14 = smov [#allocation4]  }
   0x2   :  { %s16_s13 = sshll.u32 %s500_s12, 4  ;;  %s25_s15 = sshll.u32 %s501_s14, 4  ;;  %s17_s13 = int_to_ptr.vmem [resolvable:$true] %s16_s13  ;;  %s525_s15 = int_to_ptr.vmem [resolvable:$true] %s25_s15 }
   0x3   :  { %s452_s18 = scalar_lea.hbm %s578_s0, 896 }
   0x4   :  { %p453_p0 = scmp.ne.s32.totalorder %s578_s0, %s452_s18  ;;  %p456_p1 = scmp.lt.u32.totalorder %s452_s18, %s578_s0 }
   0x6   :  { %p458_p2 = pnand %p456_p1, %p453_p0 }
   0x8   :  { %461 = shalt.err (!%p458_p2)
}
   0x9   :  { %s462_s23 = scalar_lea.vmem %s17_s13, 896  ;;  %p467_p4 = scmp.lt.s32.totalorder %s17_s13, %s17_s13 }
   0xa   :  { %p463_p3 = scmp.ne.s32.totalorder %s17_s13, %s462_s23  ;;  %p468_p5 = scmp.lt.s32.totalorder %s462_s23, %s462_s23 }
   0xc   :  { %p469_p6 = por %p468_p5, %p467_p4 }
   0xe   :  { %p470_p7 = pnand %p469_p6, %p463_p3 }
  0x10   :  { %473 = shalt.err (!%p470_p7)
}
  0x11   :  { %19 = dma.hbm_to_vmem [thread:$0]  %s578_s0, 896, %s17_s13, [#allocation3]  }
  0x12   :  { %s474_s28 = scalar_lea.hbm %s579_s1, 1792 }
  0x13   :  { %p475_p8 = scmp.ne.s32.totalorder %s579_s1, %s474_s28  ;;  %p478_p9 = scmp.lt.u32.totalorder %s474_s28, %s579_s1 }
  0x15   :  { %p480_p10 = pnand %p478_p9, %p475_p8 }
  0x17   :  { %483 = shalt.err (!%p480_p10)
}
  0x18   :  { %s484_s6 = scalar_lea.vmem %s525_s15, 1792  ;;  %p489_p12 = scmp.lt.s32.totalorder %s525_s15, %s525_s15 }
  0x19   :  { %p485_p11 = scmp.ne.s32.totalorder %s525_s15, %s484_s6  ;;  %p490_p13 = scmp.lt.s32.totalorder %s484_s6, %s484_s6 }
  0x1b   :  { %p491_p0 = por %p490_p13, %p489_p12 }
  0x1d   :  { %p492_p1 = pnand %p491_p0, %p485_p11 }
  0x1f   :  { %495 = shalt.err (!%p492_p1)
}
  0x20   :  { %s502_s0 = smov 896   ;;  %s503_s7 = smov 56  }
  0x21   :  { %31 = dma.hbm_to_vmem [thread:$0]  %s579_s1, 1792, %s525_s15, [#allocation5], %s502_s0, %s502_s0, %s503_s7  }
  0x22   :  { %496 = dma.done.wait [#allocation3], 896  }
  0x23   :  { %497 = vsyncadd [#allocation3], 4294966400 }
  0x24   :  { %498 = dma.done.wait [#allocation5], 1792  }
  0x25   :  { %499 = vsyncadd [#allocation5], 4294965504  ;;  %v504_v0 = vmov 0   ;;  %v43_v1 = vld [vmem:[#allocation2 + $0x18] sm:$0xff]  ;;  %v41_v2 = vld [vmem:[#allocation2 + $0x8] sm:$0xff]  ;;  %vm73_vm0 = vcmask 130048  }
  0x26   :  { %445 = vset.pattern.permute.xlu0 %v504_v0  ;;  %v42_v3 = vld [vmem:[#allocation2 + $0x10] sm:$0xff]  ;;  %158 = vmatprep.subr.mxu0 %v43_v1  ;;  %v40_v4 = vld [vmem:[#allocation2] sm:$0xff]  ;;  %v49_v7 = vld [vmem:[#allocation4 + $0x10] sm:$0xff]  ;;  %vm383_vm1 = vcmask 64512   ;;  %vm385_vm2 = vcmask 58368  }
  0x27   :  { %83 = vmatprep.subr.mxu1 %v41_v2  ;;  %v50_v5 = vld [vmem:[#allocation4 + $0x18] sm:$0xff]  ;;  %v48_v6 = vld [vmem:[#allocation4 + $0x8] sm:$0xff]  ;;  %159 = vmatpush1.xpose.msra.mxu0 %v42_v3  ;;  %v45_v8 = vld [vmem:[#allocation2 + $0x28] sm:$0xff] }
  0x28   :  { %84 = vmatpush1.xpose.msra.mxu1 %v40_v4  ;;  %v47_v9 = vld [vmem:[#allocation4] sm:$0xff]  ;;  %222 = vmatprep.mubr.f32.mxu0 %v50_v5  ;;  %v44_v10 = vld [vmem:[#allocation2 + $0x20] sm:$0xff]  ;;  %v57_v11 = vld [vmem:[#allocation4 + $0x50] sm:$0x3] }
  0x29   :  { %147 = vmatprep.mubr.f32.mxu1 %v48_v6  ;;  %233 = vmatprep.subr.mxu0 %v45_v8  ;;  %v55_v12 = vld [vmem:[#allocation4 + $0x40] sm:$0x3]  ;;  %v46_v13 = vld [vmem:[#allocation2 + $0x30] sm:$0xff]  ;;  %v56_v14 = vld [vmem:[#allocation4 + $0x48] sm:$0x3] }
  0x2a   :  { %223 = vmatmul.mubr.f32.vlgmr.msra.gmra.mrb[0].mxu0 %v49_v7  ;;  %v54_v15 = vld [vmem:[#allocation4 + $0x38] sm:$0x3]  ;;  %427 = vmatprep.subr.msk.mxu1 %vm73_vm0, %v46_v13  ;;  %v52_v16 = vld [vmem:[#allocation4 + $0x28] sm:$0xff]  ;;  %v53_v17 = vld [vmem:[#allocation4 + $0x30] sm:$0xff] }
  0x2b   :  { %148 = vmatmul.mubr.f32.vlgmr.msra.gmra.mrb[0].mxu1 %v47_v9  ;;  %234 = vmatpush1.xpose.msra.mxu0 %v44_v10  ;;  %v61_v18 = vld [vmem:[%s580_s2] sm:$0xff]  ;;  %v62_v19 = vld [vmem:[%s580_s2 + $0x8] sm:$0x3]  ;;  %v51_v20 = vld [vmem:[#allocation4 + $0x20] sm:$0xff] }
  0x2c   :  { %227 = vmatprep.mubr.f32.mxu0 %v57_v11  ;;  %152 = vmatprep.mubr.f32.mxu1 %v55_v12  ;;  %v60_v21 = vld [vmem:[#allocation4 + $0x68] sm:$0x3]  ;;  %v59_v22 = vld [vmem:[#allocation4 + $0x60] sm:$0x3]  ;;  %v58_v23 = vld [vmem:[#allocation4 + $0x58] sm:$0x3] }
  0x2d   :  { %428 = vmatpush3.xpose.msk.msra.mxu1 %vm73_vm0, %v46_v13  ;;  %65 = vperm.xlu0 %445, %v61_v18  }
  0x2e   :  { %228 = vmatmul.mubr.f32.gmra.mrb[2].mxu0 %v56_v14 }
  0x2f   :  { %153 = vmatmul.mubr.f32.gmra.mrb[2].mxu1 %v54_v15  ;;  %297 = vmatprep.mubr.f32.mxu0 %v52_v16 }
  0x30   :  { %429 = vmatprep.mubr.msk.f32.mxu1 %vm73_vm0, %v53_v17 }
  0x31   :  { %70 = vperm.xlu0 %445, %v62_v19  }
  0x32   :  { %298 = vmatmul.mubr.f32.vlgmr.msra.gmra.mrb[0].mxu0 %v51_v20 }
  0x33   :  { %430 = vmatmul.mubr.msk.f32.vlgmr.msra.gmra.mrb[4].mxu1 %vm73_vm0, %v60_v21  ;;  %302 = vmatprep.mubr.f32.mxu0 %v59_v22 }
  0x36   :  { %303 = vmatmul.mubr.f32.gmra.mrb[2].mxu0 %v58_v23 }
  0xac   :  { %v66_v25 = vpop.permute.xlu0 %65 }
  0xb0   :  { %v71_v30 = vpop.permute.xlu0 %70 }
  0xfe   :  { %v149_v24 = vpop.f32.mrb[0].mxu1 }
  0xff   :  { %v151_v26 = vpop.f32.mrb[1].mxu1  ;;  %v150_v28 = vadd.f32 %v149_v24, %v66_v25 }
 0x102   :  { %v154_v27 = vpop.f32.mrb[2].mxu1 }
 0x103   :  { %v156_v29 = vpop.f32.mrb[3].mxu1  ;;  %v155_v36 = vadd.f32 %v154_v27, %v71_v30 }
 0x105   :  { %v299_v31 = vpop.f32.mrb[0].mxu0 }
 0x106   :  { %v431_v32 = vpop.f32.mrb[4].mxu1  ;;  %v433_v33 = vadd.f32 %v299_v31, %v150_v28  ;;  %v301_v34 = vpop.f32.mrb[1].mxu0 }
 0x107   :  { %v374_v35 = vpop.f32.mrb[5].mxu1 }
 0x108   :  { %v375_v37 = vadd.f32 %v433_v33, %v374_v35 }
 0x109   :  { %v304_v38 = vpop.f32.mrb[2].mxu0 }
 0x10a   :  { %v435_v39 = vadd.f32 %v304_v38, %v155_v36  ;;  %v306_v40 = vpop.f32.mrb[3].mxu0  ;;  %v384_v42 = vsel %vm383_vm1, %v375_v37, -inf }
 0x10c   :  { %v380_v41 = vadd.f32 %v435_v39, %v431_v32 }
 0x10e   :  { %v386_v43 = vsel %vm385_vm2, %v380_v41, -inf }
 0x10f   :  { %v387_v44 = vmax.f32 %v384_v42, %v386_v43 }
 0x111   :  { %v388_v45 = vrot.slane %v387_v44, 4 }
 0x113   :  { %v389_v46 = vmax.f32 %v387_v44, %v388_v45 }
 0x115   :  { %v390_v47 = vrot.slane %v389_v46, 2 }
 0x117   :  { %v391_v48 = vmax.f32 %v389_v46, %v390_v47 }
 0x119   :  { %v392_v49 = vrot.slane %v391_v48, 1 }
 0x11b   :  { %v393_v50 = vmax.f32 %v391_v48, %v392_v49 }
 0x11d   :  { %v394_v51 = vsub.f32 %v375_v37, %v393_v50  ;;  %v395_v52 = vsub.f32 %v380_v41, %v393_v50 }
 0x11f   :  { %v396_v53 = vmul.f32 1.442695, %v394_v51  ;;  %v398_v54 = vmul.f32 1.442695, %v395_v52 }
 0x121   :  { %446 = vpow2.f32 %v396_v53 }
 0x122   :  { %448 = vpow2.f32 %v398_v54 }
 0x12b   :  { %v447_v55 = vpop.eup %446 }
 0x12c   :  { %v449_v56 = vpop.eup %448  ;;  %v400_v57 = vsel %vm383_vm1, %v447_v55, 0.0 }
 0x12d   :  { %v401_v58 = vsel %vm385_vm2, %v449_v56, 0.0 }
 0x12e   :  { %v402_v59 = vadd.f32 %v401_v58, %v400_v57 }
 0x130   :  { %v403_v60 = vrot.slane %v402_v59, 4 }
 0x132   :  { %v404_v61 = vadd.f32 %v403_v60, %v402_v59 }
 0x134   :  { %v405_v62 = vrot.slane %v404_v61, 2 }
 0x136   :  { %v406_v63 = vadd.f32 %v405_v62, %v404_v61 }
 0x138   :  { %v407_v0 = vrot.slane %v406_v63, 1 }
 0x13a   :  { %v408_v1 = vadd.f32 %v407_v0, %v406_v63 }
 0x13c   :  { %450 = vlog2.f32 %v408_v1 }
 0x146   :  { %v451_v2 = vpop.eup %450 }
 0x147   :  { %v410_v3 = vmul.f32 0.6931472, %v451_v2 }
 0x149   :  { %v411_v4 = vsub.f32 %v394_v51, %v410_v3  ;;  %v412_v5 = vsub.f32 %v395_v52, %v410_v3 }
 0x14b   :  { %413 = vst.msk [vmem:[%s581_s3] sm:$0xff] %vm383_vm1, %v411_v4 }
 0x14c   :  { %414 = vst.msk [vmem:[%s581_s3 + $0x8] sm:$0x3] %vm385_vm2, %v412_v5 }
 0x14d   :  { %419 = vsyncpa [#allocation3], 1 }
 0x14e   :  { %420 = vsyncpa [#allocation5], 1 }

</bundles_post_ra>
